<compile_context>
chip_gen: v7x
topology: tpu7x:2x2x1
jax: 0.10.0
libtpu: 0.0.40
codegen_flags: <defaults>
</compile_context>

<pallas_src>
import functools

import jax
import jax.numpy as jnp
from jax import lax
from jax.experimental import pallas as pl
from jax.experimental.pallas import tpu as pltpu

NUM_LAYERS = 2
HIDDEN = 32
BATCH = 8

_LANE = 128              # batch rides the 128-wide lane axis -> tile granularity
_MAX_BATCH_TILE = 2048   # [32, 2048] f32 tile = 256 KiB; trivial VMEM on all gens
_PALLAS_MIN_BATCH = 256  # below ~one tile, the fused XLA path wins


def _round_up(x, m):
    return ((x + m - 1) // m) * m


def _cdiv(a, b):
    return -(-a // b)


def _choose_batch_tiling(b):
    """Pick (tm, padded_b): tm a multiple of 128 and <= _MAX_BATCH_TILE, with
    minimal tail padding, and >= 2 grid steps whenever there are >= 2 lane
    groups so v7x's two TensorCores both get work (harmless on v5e/v6e)."""
    b128 = _round_up(max(b, 1), _LANE)
    n_groups = b128 // _LANE
    min_tiles = 2 if n_groups >= 2 else 1
    n0 = max(min_tiles, _cdiv(b128, _MAX_BATCH_TILE))
    best = None
    for n in range(n0, min(n0 + 8, n_groups) + 1):
        tm = _round_up(_cdiv(b128, n), _LANE)
        if tm > _MAX_BATCH_TILE:
            continue
        steps = _cdiv(b128, tm)
        padded = steps * tm
        cand = (padded, steps, tm)
        if best is None or cand[:2] < best[:2]:
            best = cand
    if best is None:  # unreachable; defensive
        tm = min(_MAX_BATCH_TILE, b128)
        best = (_cdiv(b128, tm) * tm, _cdiv(b128, tm), tm)
    padded, _steps, tm = best
    return tm, padded


def _mlp_kernel(num_layers, x_ref, w_ref, b_ref, wf_ref, bf_ref, o_ref):
    """Fused MLP forward.

    x_ref : [TM, H]    batch tile in native row-major layout (VMEM)
    w_ref : [L, H, H]  per-layer weights, torch [out, in] layout
    b_ref : [L, H, 1]  per-layer biases (column vectors)
    wf_ref: [H, 1]     final projection weight (column)
    bf_ref: [1, 1]     final projection bias
    o_ref : [1, TM]    output logits, lane-dense, batch on lanes
    """
    x = x_ref[...].astype(jnp.float32)
    if num_layers == 0:
        # Model degenerates to a single Linear(H, 1): features on sublanes.
        h = x.T
    else:
        # Layer 0: h = W0 @ x^T + b0  -> [H, TM] with batch on the lane axis.
        # Contracting on x's feature axis folds the transpose into the MXU
        # operand feed (no HBM relayout in the wrapper).
        h = lax.dot_general(
            w_ref[0], x,
            dimension_numbers=(((1,), (1,)), ((), ())),
            preferred_element_type=jnp.float32) + b_ref[0]
        h = jnp.maximum(h, 0.0)  # ReLU on the VPU
        # Layers 1..L-1: small static unrolled loop, feature-major throughout.
        for i in range(1, num_layers):
            h = jnp.dot(w_ref[i], h,
                        preferred_element_type=jnp.float32) + b_ref[i]
            h = jnp.maximum(h, 0.0)
    # Final H->1 projection off the MXU: VPU multiply + XLU sublane reduce.
    # Result is naturally lane-dense [1, TM].
    logits = jnp.sum(h * wf_ref[...], axis=0, keepdims=True) + bf_ref[...]
    o_ref[...] = logits.astype(o_ref.dtype)


def _xla_forward(x, weights, biases, w_final, b_final):
    """Plain-jnp forward (torch-equivalent). Used as the small-batch bypass
    and as the correctness reference."""
    h = x.astype(jnp.float32)
    for i in range(weights.shape[0]):
        h = jnp.maximum(h @ weights[i].T + biases[i][:, 0], 0.0)
    return h @ w_final + b_final


def language_detector_forward(x, weights, biases, w_final, b_final,
                              *, force_pallas=False):
    """x: [B, H] f32 (native layout); weights: [L, H, H] (torch [out, in]);
    biases: [L, H, 1]; w_final: [H, 1]; b_final: [1, 1]. Returns [B, 1] f32."""
    B, H = x.shape
    L = int(weights.shape[0])

    # Small-batch bypass: below one tile, pallas_call launch + lane padding
    # dominate and XLA fuses the tiny matmuls just fine.
    if not force_pallas and B < _PALLAS_MIN_BATCH:
        return _xla_forward(x, weights, biases, w_final, b_final)

    if L == 0:
        # Keep BlockSpec leading dims non-zero; the kernel ignores them.
        weights = jnp.zeros((1, H, H), jnp.float32)
        biases = jnp.zeros((1, H, 1), jnp.float32)
    Lb = int(weights.shape[0])

    tm, padded_b = _choose_batch_tiling(B)
    grid = (padded_b // tm,)

    kernel = functools.partial(_mlp_kernel, L)

    flops = 2 * padded_b * H * H * max(L, 1) + 3 * padded_b * H
    bytes_accessed = (B * H * 4 + padded_b * 4
                      + Lb * H * H * 4 + Lb * H * 4 + H * 4 + 4)

    out = pl.pallas_call(
        kernel,
        out_shape=jax.ShapeDtypeStruct((1, padded_b), jnp.float32),
        grid=grid,
        in_specs=[
            # x: one [tm, H] batch tile per grid step, native layout. No pad:
            # a ragged final block is safe because batch rows are independent
            # and padded output lanes are sliced off below.
            pl.BlockSpec((tm, H), lambda i: (i, 0)),
            # Weights/biases: constant index_map -> stay VMEM-resident.
            pl.BlockSpec((Lb, H, H), lambda i: (0, 0, 0)),
            pl.BlockSpec((Lb, H, 1), lambda i: (0, 0, 0)),
            pl.BlockSpec((H, 1), lambda i: (0, 0)),
            pl.BlockSpec((1, 1), lambda i: (0, 0)),
        ],
        out_specs=pl.BlockSpec((1, tm), lambda i: (0, i)),
        compiler_params=pltpu.CompilerParams(
            dimension_semantics=("parallel",)),
        cost_estimate=pl.CostEstimate(
            flops=flops, transcendentals=0, bytes_accessed=bytes_accessed),
    )(x.astype(jnp.float32), weights, biases, w_final, b_final)

    return out[0, :B].reshape(B, 1)


def init_params(key, num_layers, hidden):
    """Deterministic init mirroring torch.nn.Linear layouts.

    torch Linear(hidden, hidden).weight is [out, in] -- kept as-is since the
    kernel computes h_new = W @ h in the feature-major layout. Biases are
    stored as [H, 1] columns. Final Linear(hidden, 1) weight [1, H] is stored
    transposed as [H, 1]."""
    keys = jax.random.split(key, 2 * num_layers + 2)
    bound = 1.0 / jnp.sqrt(hidden)
    ws, bs = [], []
    for i in range(num_layers):
        w = jax.random.uniform(keys[2 * i], (hidden, hidden),
                               minval=-bound, maxval=bound, dtype=jnp.float32)
        b = jax.random.uniform(keys[2 * i + 1], (hidden, 1),
                               minval=-bound, maxval=bound, dtype=jnp.float32)
        ws.append(w)
        bs.append(b)
    weights = (jnp.stack(ws, axis=0) if num_layers > 0
               else jnp.zeros((0, hidden, hidden), jnp.float32))
    biases = (jnp.stack(bs, axis=0) if num_layers > 0
              else jnp.zeros((0, hidden, 1), jnp.float32))
    w_final = jax.random.uniform(keys[-2], (hidden, 1),
                                 minval=-bound, maxval=bound, dtype=jnp.float32)
    b_final = jax.random.uniform(keys[-1], (1, 1),
                                 minval=-bound, maxval=bound, dtype=jnp.float32)
    return weights, biases, w_final, b_final


if __name__ == "__main__":
    key = jax.random.PRNGKey(0)
    k_x, k_x2, k_p = jax.random.split(key, 3)

    weights, biases, w_final, b_final = init_params(k_p, NUM_LAYERS, HIDDEN)

    # 1) Shipped small shape (B=8): default call takes the fused-XLA bypass,
    #    forced call exercises the Pallas kernel at a single 128-lane tile.
    x_small = jax.random.normal(k_x, (BATCH, HIDDEN), dtype=jnp.float32)
    out_bypass = jax.block_until_ready(
        language_detector_forward(x_small, weights, biases, w_final, b_final))
    out_pallas_small = jax.block_until_ready(
        language_detector_forward(x_small, weights, biases, w_final, b_final,
                                  force_pallas=True))
    ref_small = _xla_forward(x_small, weights, biases, w_final, b_final)
    assert out_bypass.shape == (BATCH, 1), out_bypass.shape
    assert out_pallas_small.shape == (BATCH, 1), out_pallas_small.shape
    assert jnp.allclose(out_bypass, ref_small, atol=1e-4, rtol=1e-4), (
        float(jnp.max(jnp.abs(out_bypass - ref_small))))
    assert jnp.allclose(out_pallas_small, ref_small, atol=1e-4, rtol=1e-4), (
        float(jnp.max(jnp.abs(out_pallas_small - ref_small))))

    # 2) Larger batch exercising a multi-step "parallel" grid and a ragged
    #    final block (B=300 -> tm=128, grid=(3,), last block partial).
    B_LARGE = 300
    x_large = jax.random.normal(k_x2, (B_LARGE, HIDDEN), dtype=jnp.float32)
    out_large = jax.block_until_ready(
        language_detector_forward(x_large, weights, biases, w_final, b_final))
    ref_large = _xla_forward(x_large, weights, biases, w_final, b_final)
    assert out_large.shape == (B_LARGE, 1), out_large.shape
    assert jnp.allclose(out_large, ref_large, atol=1e-4, rtol=1e-4), (
        float(jnp.max(jnp.abs(out_large - ref_large))))

    print("KERNEL_OK")
</pallas_src>

<mosaic_0001>
module attributes {stable_mosaic.version = 11 : i64} {
  func.func @_mlp_kernel(%arg0: i32, %arg1: memref<128x32xf32, #tpu.memory_space<vmem>>, %arg2: memref<2x32x32xf32, #tpu.memory_space<vmem>>, %arg3: memref<2x32x1xf32, #tpu.memory_space<vmem>>, %arg4: memref<32x1xf32, #tpu.memory_space<vmem>>, %arg5: memref<1x1xf32, #tpu.memory_space<vmem>>, %arg6: memref<1x128xf32, #tpu.memory_space<vmem>>) attributes {dimension_semantics = [#tpu.dimension_semantics<parallel>], iteration_bounds = array<i64: 1>, scalar_prefetch = 0 : i64, scratch_operands = 0 : i64, tpu.core_type = #tpu.core_type<tc>, window_params = [{transform_indices = @transform_0, window_bounds = array<i64: 128, 32>}, {pipeline_mode = #tpu.pipeline_mode<synchronous>, transform_indices = @transform_1, window_bounds = array<i64: 2, 32, 32>}, {pipeline_mode = #tpu.pipeline_mode<synchronous>, transform_indices = @transform_2, window_bounds = array<i64: 2, 32, 1>}, {pipeline_mode = #tpu.pipeline_mode<synchronous>, transform_indices = @transform_3, window_bounds = array<i64: 32, 1>}, {pipeline_mode = #tpu.pipeline_mode<synchronous>, transform_indices = @transform_4, window_bounds = array<i64: 1, 1>}, {transform_indices = @transform_5, window_bounds = array<i64: 1, 128>}]} {
    %c0 = arith.constant 0 : index
    %c0_0 = arith.constant 0 : index
    %0 = vector.load %arg1[%c0, %c0_0] : memref<128x32xf32, #tpu.memory_space<vmem>>, vector<128x32xf32>
    %c0_1 = arith.constant 0 : index
    %c0_2 = arith.constant 0 : index
    %c0_3 = arith.constant 0 : index
    %1 = vector.load %arg2[%c0_1, %c0_2, %c0_3] : memref<2x32x32xf32, #tpu.memory_space<vmem>>, vector<1x32x32xf32>
    %2 = vector.shape_cast %1 : vector<1x32x32xf32> to vector<32x32xf32>
    %cst = arith.constant dense<0.000000e+00> : vector<32x128xf32>
    %3 = tpu.matmul %2, %0, %cst {dimension_numbers = #tpu.dot_dimension_numbers<[1], [1], [0], [0], [0, 0, 1, 0], [], []>} : vector<32x32xf32>, vector<128x32xf32>, vector<32x128xf32> -> vector<32x128xf32>
    %c0_4 = arith.constant 0 : index
    %c0_5 = arith.constant 0 : index
    %c0_6 = arith.constant 0 : index
    %4 = vector.load %arg3[%c0_4, %c0_5, %c0_6] : memref<2x32x1xf32, #tpu.memory_space<vmem>>, vector<1x32x1xf32>
    %5 = vector.shape_cast %4 : vector<1x32x1xf32> to vector<32x1xf32>
    %6 = vector.broadcast %5 : vector<32x1xf32> to vector<32x128xf32>
    %7 = arith.addf %3, %6 : vector<32x128xf32>
    %cst_7 = arith.constant 0.000000e+00 : f32
    %8 = vector.broadcast %cst_7 : f32 to vector<32x128xf32>
    %9 = arith.maximumf %7, %8 : vector<32x128xf32>
    %c1 = arith.constant 1 : index
    %c0_8 = arith.constant 0 : index
    %c0_9 = arith.constant 0 : index
    %10 = vector.load %arg2[%c1, %c0_8, %c0_9] : memref<2x32x32xf32, #tpu.memory_space<vmem>>, vector<1x32x32xf32>
    %11 = vector.shape_cast %10 : vector<1x32x32xf32> to vector<32x32xf32>
    %cst_10 = arith.constant dense<0.000000e+00> : vector<32x128xf32>
    %12 = tpu.matmul %11, %9, %cst_10 {dimension_numbers = #tpu.dot_dimension_numbers<[1], [0], [0], [1], [0, 0, 1, 1], [], []>} : vector<32x32xf32>, vector<32x128xf32>, vector<32x128xf32> -> vector<32x128xf32>
    %c1_11 = arith.constant 1 : index
    %c0_12 = arith.constant 0 : index
    %c0_13 = arith.constant 0 : index
    %13 = vector.load %arg3[%c1_11, %c0_12, %c0_13] : memref<2x32x1xf32, #tpu.memory_space<vmem>>, vector<1x32x1xf32>
    %14 = vector.shape_cast %13 : vector<1x32x1xf32> to vector<32x1xf32>
    %15 = vector.broadcast %14 : vector<32x1xf32> to vector<32x128xf32>
    %16 = arith.addf %12, %15 : vector<32x128xf32>
    %cst_14 = arith.constant 0.000000e+00 : f32
    %17 = vector.broadcast %cst_14 : f32 to vector<32x128xf32>
    %18 = arith.maximumf %16, %17 : vector<32x128xf32>
    %c0_15 = arith.constant 0 : index
    %c0_16 = arith.constant 0 : index
    %19 = vector.load %arg4[%c0_15, %c0_16] : memref<32x1xf32, #tpu.memory_space<vmem>>, vector<32x1xf32>
    %20 = vector.broadcast %19 : vector<32x1xf32> to vector<32x128xf32>
    %21 = arith.mulf %18, %20 : vector<32x128xf32>
    %cst_17 = arith.constant dense<0.000000e+00> : vector<128xf32>
    %22 = vector.multi_reduction <add>, %21, %cst_17 [0] : vector<32x128xf32> to vector<128xf32>
    %23 = vector.shape_cast %22 : vector<128xf32> to vector<1x128xf32>
    %c0_18 = arith.constant 0 : index
    %c0_19 = arith.constant 0 : index
    %24 = vector.load %arg5[%c0_18, %c0_19] : memref<1x1xf32, #tpu.memory_space<vmem>>, vector<1x1xf32>
    %25 = vector.broadcast %24 : vector<1x1xf32> to vector<1x128xf32>
    %26 = arith.addf %23, %25 : vector<1x128xf32>
    %c0_20 = arith.constant 0 : index
    %c0_21 = arith.constant 0 : index
    %27 = vector.load %arg6[%c0_20, %c0_21] : memref<1x128xf32, #tpu.memory_space<vmem>>, vector<1x128xf32>
    tpu.vector_store %arg6[%c0_20, %c0_21], %26 {strides = array<i32>} : memref<1x128xf32, #tpu.memory_space<vmem>>, vector<1x128xf32>,
    return
  }
  func.func @transform_0(%arg0: i32) -> (i32, i32) {
    %c0_i32 = arith.constant 0 : i32
    %c0_i32_0 = arith.constant 0 : i32
    return %arg0, %c0_i32 : i32, i32
  }
  func.func @transform_1(%arg0: i32) -> (i32, i32, i32) {
    %c0_i32 = arith.constant 0 : i32
    %c0_i32_0 = arith.constant 0 : i32
    %c0_i32_1 = arith.constant 0 : i32
    %c0_i32_2 = arith.constant 0 : i32
    return %c0_i32, %c0_i32_0, %c0_i32_1 : i32, i32, i32
  }
  func.func @transform_2(%arg0: i32) -> (i32, i32, i32) {
    %c0_i32 = arith.constant 0 : i32
    %c0_i32_0 = arith.constant 0 : i32
    %c0_i32_1 = arith.constant 0 : i32
    %c0_i32_2 = arith.constant 0 : i32
    return %c0_i32, %c0_i32_0, %c0_i32_1 : i32, i32, i32
  }
  func.func @transform_3(%arg0: i32) -> (i32, i32) {
    %c0_i32 = arith.constant 0 : i32
    %c0_i32_0 = arith.constant 0 : i32
    %c0_i32_1 = arith.constant 0 : i32
    return %c0_i32, %c0_i32_0 : i32, i32
  }
  func.func @transform_4(%arg0: i32) -> (i32, i32) {
    %c0_i32 = arith.constant 0 : i32
    %c0_i32_0 = arith.constant 0 : i32
    %c0_i32_1 = arith.constant 0 : i32
    return %c0_i32, %c0_i32_0 : i32, i32
  }
  func.func @transform_5(%arg0: i32) -> (i32, i32) {
    %c0_i32 = arith.constant 0 : i32
    %c0_i32_0 = arith.constant 0 : i32
    return %c0_i32, %arg0 : i32, i32
  }
}

</mosaic_0001>

<bundles_post_ra>
// kernel: tpu_custom_call.1
= control target key start
LH: loop header
LB: loop body
LE: loop exit
PB: predicated region body
PF: predicated region fallthrough
CT: control target
= control target key end

     0   :  { %s808_s0 = inlined_call_operand.vmem [shape: f32[8,32], index: 0, kind: input, shape index: {}]   ;;  %s809_s1 = inlined_call_operand.vmem [shape: f32[2,32,32], index: 1, kind: input, shape index: {}]   ;;  %s810_s2 = inlined_call_operand.vmem [shape: f32[2,32,1], index: 2, kind: input, shape index: {}]   ;;  %s811_s3 = inlined_call_operand.vmem [shape: f32[32,1], index: 3, kind: input, shape index: {}]   ;;  %s812_s4 = inlined_call_operand.<no memory space> [shape: f32[1,1], index: 4, kind: input, shape index: {}]   ;;  %s813_s5 = inlined_call_operand.hbm [shape: f32[1,128], index: 5, kind: output, shape index: {}]  }
   0x1   :  { %v10_v0 = vstv %s812_s4 }
   0x2   :  { %11 = vst [vmem:[#allocation2] sm:$0x1] %v10_v0 }
   0x3   :  { %v23_v1 = vld [vmem:[%s808_s0] sm:$0xff]  ;;  %v24_v2 = vld [vmem:[%s808_s0 + $0x8] sm:$0xff]  ;;  %vm67_vm0 = vcmask 261120   ;;  %v25_v3 = vld [vmem:[%s808_s0 + $0x10] sm:$0xff]  ;;  %v607_v7 = vmov 0  }
   0x4   :  { %v523_v4 = vpack.c.bf16 %v24_v2, %v23_v1  ;;  %vm653_vm1 = vmpackc.low %vm67_vm0, %vm67_vm0  ;;  %v26_v6 = vld [vmem:[%s808_s0 + $0x18] sm:$0xff]  ;;  %581 = vset.pattern.permute.xlu0 %v607_v7  ;;  %582 = vset.pattern.permute.xlu1 %v607_v7  ;;  %v39_v9 = vld [vmem:[%s809_s1] sm:$0xff] }
   0x5   :  { %v529_v8 = vpack.c.bf16 %v26_v6, %v25_v3  ;;  %v27_v10 = vld [vmem:[%s808_s0 + $0x20] sm:$0xff]  ;;  %v28_v11 = vld [vmem:[%s808_s0 + $0x28] sm:$0xff]  ;;  %503 = vmatprep.mubr.msk.f32.mxu0 %vm67_vm0, %v39_v9  ;;  %v45_v13 = vld [vmem:[%s810_s2 + $0x10] sm:$0xff] }
   0x6   :  { %525 = vmatprep.subr.msk.bf16.mxu0 %vm653_vm1, %v523_v4  ;;  %v43_v12 = vld [vmem:[%s810_s2] sm:$0xff]  ;;  %59 = vperm.xlu1 %582, %v45_v13   ;;  %v535_v14 = vpack.c.bf16 %v28_v11, %v27_v10  ;;  %v44_v15 = vld [vmem:[%s810_s2 + $0x8] sm:$0xff]  ;;  %v46_v16 = vld [vmem:[%s810_s2 + $0x18] sm:$0xff] }
   0x7   :  { %528 = vmatpush3.bf16.xpose.msk.msra.mxu0 %vm653_vm1, %v523_v4  ;;  %49 = vperm.xlu0 %581, %v43_v12  }
   0x8   :  { %531 = vmatprep.subr.msk.bf16.mxu0 %vm653_vm1, %v529_v8 }
   0x9   :  { %12 = vsyncpa [#allocation4], 0  ;;  %v435_v17 = vld [vmem:[%s810_s2 + $0x20] sm:$0xff]  ;;  %v29_v18 = vld [vmem:[%s808_s0 + $0x30] sm:$0xff] }
   0xa   :  { %64 = vperm.xlu1 %582, %v46_v16   ;;  %v30_v19 = vld [vmem:[%s808_s0 + $0x38] sm:$0xff]  ;;  %v436_v20 = vld [vmem:[%s810_s2 + $0x28] sm:$0xff]  ;;  %v437_v22 = vld [vmem:[%s810_s2 + $0x30] sm:$0xff] }
   0xb   :  { %54 = vperm.xlu0 %581, %v44_v15   ;;  %v541_v21 = vpack.c.bf16 %v30_v19, %v29_v18  ;;  %v438_v23 = vld [vmem:[%s810_s2 + $0x38] sm:$0xff]  ;;  %v348_v24 = vld [vmem:[%s811_s3] sm:$0xff]  ;;  %v32_v26 = vld [vmem:[%s808_s0 + $0x48] sm:$0xff] }
   0xc   :  { %v31_v25 = vld [vmem:[%s808_s0 + $0x40] sm:$0xff]  ;;  %v349_v27 = vld [vmem:[%s811_s3 + $0x8] sm:$0xff]  ;;  %v350_v29 = vld [vmem:[%s811_s3 + $0x10] sm:$0xff] }
   0xd   :  { %v547_v28 = vpack.c.bf16 %v32_v26, %v31_v25  ;;  %v351_v30 = vld [vmem:[%s811_s3 + $0x18] sm:$0xff]  ;;  %v385_v31 = vld [vmem:[#allocation2] sm:$0x1]  ;;  %v33_v32 = vld [vmem:[%s808_s0 + $0x50] sm:$0xff] }
   0xe   :  { %234 = vperm.xlu1 %582, %v436_v20   ;;  %v34_v33 = vld [vmem:[%s808_s0 + $0x58] sm:$0xff]  ;;  %v35_v35 = vld [vmem:[%s808_s0 + $0x60] sm:$0xff]  ;;  %v36_v36 = vld [vmem:[%s808_s0 + $0x68] sm:$0xff] }
   0xf   :  { %534 = vmatpush3.bf16.xpose.msk.msra.mxu0 %vm653_vm1, %v529_v8  ;;  %229 = vperm.xlu0 %581, %v435_v17   ;;  %v553_v34 = vpack.c.bf16 %v34_v33, %v33_v32  ;;  %v559_v37 = vpack.c.bf16 %v36_v36, %v35_v35  ;;  %v37_v38 = vld [vmem:[%s808_s0 + $0x70] sm:$0xff]  ;;  %v38_v39 = vld [vmem:[%s808_s0 + $0x78] sm:$0xff]  ;;  %v40_v41 = vld [vmem:[%s809_s1 + $0x8] sm:$0xff] }
  0x10   :  { %537 = vmatprep.subr.msk.bf16.mxu0 %vm653_vm1, %v535_v14  ;;  %v565_v40 = vpack.c.bf16 %v38_v39, %v37_v38  ;;  %v41_v42 = vld [vmem:[%s809_s1 + $0x10] sm:$0xff]  ;;  %v42_v43 = vld [vmem:[%s809_s1 + $0x18] sm:$0xff]  ;;  %v431_v44 = vld [vmem:[%s809_s1 + $0x20] sm:$0xff] }
  0x11   :  { %517 = vmatprep.mubr.msk.f32.mxu1 %vm67_vm0, %v431_v44  ;;  %v432_v63 = vld [vmem:[%s809_s1 + $0x28] sm:$0xff]  ;;  %v433_v0 = vld [vmem:[%s809_s1 + $0x30] sm:$0xff]  ;;  %v434_v1 = vld [vmem:[%s809_s1 + $0x38] sm:$0xff]  ;;  %s608_s1 = smov [#allocation3]  }
  0x12   :  { %244 = vperm.xlu1 %582, %v438_v23   ;;  %s403_s10 = sshll.u32 %s608_s1, 4  ;;  %s404_s10 = int_to_ptr.vmem [resolvable:$true] %s403_s10 }
  0x13   :  { %239 = vperm.xlu0 %581, %v437_v22   ;;  %s583_s11 = scalar_lea.vmem %s404_s10, 16  ;;  %s587_s12 = scalar_lea.vmem %s404_s10, 32 }
  0x14   :  { %p584_p0 = scmp.ne.s32.totalorder %s404_s10, %s583_s11  ;;  %p588_p1 = scmp.lt.s32.totalorder %s404_s10, %s404_s10 }
  0x15   :  { %p589_p2 = scmp.lt.s32.totalorder %s587_s12, %s583_s11 }
  0x16   :  { %359 = vperm.xlu1 %582, %v349_v27  }
  0x17   :  { %540 = vmatpush3.bf16.xpose.msk.msra.mxu0 %vm653_vm1, %v535_v14  ;;  %354 = vperm.xlu0 %581, %v348_v24   ;;  %p590_p3 = por %p589_p2, %p588_p1 }
  0x18   :  { %543 = vmatprep.subr.msk.bf16.mxu0 %vm653_vm1, %v541_v21 }
  0x19   :  { %p591_p4 = pnand %p590_p3, %p584_p0 }
  0x1a   :  { %369 = vperm.xlu1 %582, %v351_v30  }
  0x1b   :  { %364 = vperm.xlu0 %581, %v350_v29  }
  0x1f   :  { %546 = vmatpush3.bf16.xpose.msk.msra.mxu0 %vm653_vm1, %v541_v21  ;;  %388 = vperm.xlu0 %581, %v385_v31  }
  0x20   :  { %549 = vmatprep.subr.msk.bf16.mxu0 %vm653_vm1, %v547_v28 }
  0x27   :  { %552 = vmatpush3.bf16.xpose.msk.msra.mxu0 %vm653_vm1, %v547_v28  ;;  %v391_v28 = vlaneseq }
  0x28   :  { %555 = vmatprep.subr.msk.bf16.mxu0 %vm653_vm1, %v553_v34 }
  0x29   :  { %v392_v31 = vshrl.u32 %v391_v28, 7 }
  0x2f   :  { %558 = vmatpush3.bf16.xpose.msk.msra.mxu0 %vm653_vm1, %v553_v34  ;;  %v393_v34 = vsub.s32 0, %v392_v31 }
  0x30   :  { %561 = vmatprep.subr.msk.bf16.mxu0 %vm653_vm1, %v559_v37 }
  0x37   :  { %564 = vmatpush3.bf16.xpose.msk.msra.mxu0 %vm653_vm1, %v559_v37 }
  0x38   :  { %567 = vmatprep.subr.msk.bf16.mxu0 %vm653_vm1, %v565_v40 }
  0x3f   :  { %570 = vmatpush3.bf16.xpose.msk.msra.mxu0 %vm653_vm1, %v565_v40 }
  0x46   :  { %504 = vmatmul.mubr.msk.f32.vlgmr.msra.gmra.mrb[0].mxu0 %vm67_vm0, %v40_v41 }
  0x47   :  { %506 = vmatprep.mubr.msk.f32.mxu0 %vm67_vm0, %v41_v42 }
  0x4a   :  { %507 = vmatmul.mubr.msk.f32.gmra.mrb[2].mxu0 %vm67_vm0, %v42_v43 }
  0x85   :  { %v60_v46 = vpop.permute.xlu1 %59 }
  0x86   :  { %v50_v45 = vpop.permute.xlu0 %49 }
  0x89   :  { %v65_v53 = vpop.permute.xlu1 %64 }
  0x8a   :  { %v55_v47 = vpop.permute.xlu0 %54 }
  0x8d   :  { %v235_v3 = vpop.permute.xlu1 %234 }
  0x8e   :  { %v230_v2 = vpop.permute.xlu0 %229 }
  0x91   :  { %v245_v5 = vpop.permute.xlu1 %244 }
  0x92   :  { %v240_v4 = vpop.permute.xlu0 %239 }
  0x95   :  { %v360_v12 = vpop.permute.xlu1 %359 }
  0x96   :  { %v355_v10 = vpop.permute.xlu0 %354 }
  0x99   :  { %v370_v25 = vpop.permute.xlu1 %369 }
  0x9a   :  { %v365_v23 = vpop.permute.xlu0 %364 }
  0x9e   :  { %v389_v36 = vpop.permute.xlu0 %388 }
  0x9f   :  { %v394_v38 = vrot.slane %v389_v36, %v393_v34 }
 0x119   :  { %v505_v48 = vpop.f32.mrb[0].mxu0 }
 0x11a   :  { %v200_v49 = vadd.f32 %v505_v48, %v55_v47  ;;  %v194_v50 = vpop.f32.mrb[1].mxu0 }
 0x11b   :  { %v195_v51 = vadd.f32 %v194_v50, %v50_v45 }
 0x11c   :  { %v214_v52 = vmax.f32 %v200_v49, 0.0 }
 0x11d   :  { %v213_v54 = vmax.f32 %v195_v51, 0.0  ;;  %v508_v55 = vpop.f32.mrb[2].mxu0 }
 0x11e   :  { %v210_v56 = vadd.f32 %v508_v55, %v65_v53  ;;  %v204_v57 = vpop.f32.mrb[3].mxu0 }
 0x11f   :  { %v205_v58 = vadd.f32 %v204_v57, %v60_v46  ;;  %v571_v59 = vpack.c.bf16 %v214_v52, %v213_v54 }
 0x120   :  { %v216_v60 = vmax.f32 %v210_v56, 0.0 }
 0x121   :  { %v215_v61 = vmax.f32 %v205_v58, 0.0  ;;  %572 = vmatprep.subr.bf16.mxu1 %v571_v59 }
 0x122   :  { %574 = vmatpush3.bf16.msra.mxu1 %v571_v59 }
 0x123   :  { %v575_v62 = vpack.c.bf16 %v216_v60, %v215_v61 }
 0x125   :  { %576 = vmatprep.subr.bf16.mxu1 %v575_v62 }
 0x126   :  { %578 = vmatpush3.bf16.msra.mxu1 %v575_v62 }
 0x129   :  { %518 = vmatmul.mubr.msk.f32.vlgmr.msra.gmra.mrb[0].mxu1 %vm67_vm0, %v432_v63 }
 0x12a   :  { %520 = vmatprep.mubr.msk.f32.mxu1 %vm67_vm0, %v433_v0 }
 0x12d   :  { %521 = vmatmul.mubr.msk.f32.gmra.mrb[2].mxu1 %vm67_vm0, %v434_v1 }
 0x1fc   :  { %v519_v6 = vpop.f32.mrb[0].mxu1 }
 0x1fd   :  { %v331_v7 = vadd.f32 %v519_v6, %v235_v3  ;;  %v325_v8 = vpop.f32.mrb[1].mxu1 }
 0x1fe   :  { %v326_v9 = vadd.f32 %v325_v8, %v230_v2 }
 0x1ff   :  { %v345_v11 = vmax.f32 %v331_v7, 0.0 }
 0x200   :  { %v344_v13 = vmax.f32 %v326_v9, 0.0  ;;  %v522_v14 = vpop.f32.mrb[2].mxu1 }
 0x201   :  { %v373_v15 = vmul.f32 %v360_v12, %v345_v11  ;;  %v341_v16 = vadd.f32 %v522_v14, %v245_v5  ;;  %v335_v17 = vpop.f32.mrb[3].mxu1 }
 0x202   :  { %v372_v18 = vmul.f32 %v355_v10, %v344_v13  ;;  %v336_v19 = vadd.f32 %v335_v17, %v240_v4 }
 0x203   :  { %v347_v21 = vmax.f32 %v341_v16, 0.0 }
 0x204   :  { %v376_v20 = vadd.f32 %v373_v15, %v372_v18  ;;  %v346_v22 = vmax.f32 %v336_v19, 0.0 }
 0x205   :  { %v375_v26 = vmul.f32 %v370_v25, %v347_v21 }
 0x206   :  { %v374_v24 = vmul.f32 %v365_v23, %v346_v22 }
 0x208   :  { %v377_v27 = vadd.f32 %v376_v20, %v374_v24 }
 0x20a   :  { %v378_v29 = vadd.f32 %v377_v27, %v375_v26 }
 0x20c   :  { %v379_v30 = vrot.slane %v378_v29, 4 }
 0x20e   :  { %v380_v32 = vadd.f32 %v379_v30, %v378_v29 }
 0x210   :  { %v381_v33 = vrot.slane %v380_v32, 2 }
 0x212   :  { %v382_v35 = vadd.f32 %v381_v33, %v380_v32 }
 0x214   :  { %v383_v37 = vrot.slane %v382_v35, 1 }
 0x216   :  { %v384_v39 = vadd.f32 %v383_v37, %v382_v35 }
 0x218   :  { %v395_v40 = vadd.f32 %v394_v38, %v384_v39 }
 0x21a   :  { %396 = vst [vmem:[#allocation3] sm:$0x1] %v395_v40 }
 0x21b   :  { %594 = shalt.err (!%p591_p4)
}
 0x21c   :  { %s595_s15 = scalar_lea.hbm %s813_s5, 16 }
 0x21d   :  { %p596_p5 = scmp.ne.s32.totalorder %s813_s5, %s595_s15  ;;  %p599_p6 = scmp.lt.u32.totalorder %s595_s15, %s813_s5 }
 0x21f   :  { %p601_p7 = pnand %p599_p6, %p596_p5 }
 0x221   :  { %604 = shalt.err (!%p601_p7)
}
 0x222   :  { %406 = dma.vmem_to_hbm [thread:$0]  %s404_s10, 16, %s813_s5, [#allocation4]  }
 0x223   :  { %605 = dma.done.wait [#allocation4], 16  }
 0x224   :  { %606 = vsyncadd [#allocation4], 4294967280 }
 0x225   :  { %410 = vsyncpa [#allocation4], 1 }

</bundles_post_ra>
